<compile_context>
chip_gen: v5e
topology: v5e:2x2
jax: 0.10.0
libtpu: 0.0.40
codegen_flags: <defaults>
</compile_context>

<pallas_src>
import functools

import numpy as np
import jax
import jax.numpy as jnp
from jax import lax
from jax.experimental import pallas as pl
from jax.experimental.pallas import tpu as pltpu

_EPS = 1e-5
_VMEM = pl.BlockSpec(memory_space=pltpu.MemorySpace.VMEM)


# ----------------------------------------------------------------------------
# Fused SepConv kernel (single block, lane-dense (C, N*Ho*Wo) layout)
# ----------------------------------------------------------------------------
def _sep_conv_kernel(xp_ref, mask_ref, dw1_ref, pw1_ref, g1_ref, b1_ref,
                     dw2_ref, pw2_ref, g2_ref, b2_ref, o_ref,
                     *, c_in, c_out, n, ho, wo, eps):
    f32 = jnp.float32
    S = n * ho * wo
    inv_m = 1.0 / float(S)   # BN normalizer (biased variance, like PyTorch)

    def shift(slab, dh, dw):
        # out[., n*Ho*Wo + h*Wo + w] = slab[., n*Ho*Wo + (h+dh)*Wo + (w+dw)],
        # zeroed where (h+dh, w+dw) leaves the image.  If both coordinates are
        # in range the flat source index stays inside the same image, so the
        # two precomputed edge masks are sufficient (all wrap-around reads get
        # masked).  Roll is XLU; the mask multiply is one VALU op.
        amt = dh * wo + dw
        if amt == 0:
            return slab
        rolled = pltpu.roll(slab, (-amt) % S, 1)
        return rolled * mask_ref[dh + 1, dw + 1:dw + 2]          # (1, S)

    def bn_relu(a, gamma, beta):
        # Training-mode BatchNorm over N*H*W (= the lane axis) per channel.
        s1 = jnp.sum(a, axis=-1, keepdims=True)                  # (C, 1)
        s2 = jnp.sum(a * a, axis=-1, keepdims=True)              # (C, 1)
        mean = s1 * inv_m
        var = s2 * inv_m - mean * mean                           # one-pass, f32
        inv = lax.rsqrt(var + eps)
        return jnp.maximum((a - mean) * (inv * gamma) + beta, 0.0)

    def one_by_one(acc, pw_ref):
        # 1x1 conv as C_in stacked broadcast-FMAs: (Co,1) * (1,S) -> (Co,S).
        # TODO(synk): switch to an MXU jnp.dot((Co,C),(C,S)) at production C.
        y = None
        for ci in range(c_in):
            t = pw_ref[:, ci:ci + 1] * acc[ci:ci + 1, :]
            y = t if y is None else y + t
        return y

    # ---- Block 1: depthwise 3x3, stride 2, pad 1 (via parity planes) --------
    planes = ((xp_ref[0, 0], xp_ref[0, 1]),
              (xp_ref[1, 0], xp_ref[1, 1]))                      # each (C_in, S)
    # tap k (stride 2, pad 1): source index 2*o + k - 1 -> (parity, +/-1 shift)
    sel = ((1, -1), (0, 0), (1, 0))
    acc1 = None
    for ki in range(3):
        pr, dh = sel[ki]
        for kj in range(3):
            pc, dw = sel[kj]
            k = ki * 3 + kj
            term = shift(planes[pr][pc], dh, dw) * dw1_ref[:, k:k + 1]
            acc1 = term if acc1 is None else acc1 + term
    y1 = bn_relu(one_by_one(acc1, pw1_ref), g1_ref[...], b1_ref[...])

    # ---- Block 2: depthwise 3x3, stride 1, pad 1 -----------------------------
    acc2 = None
    for ki in range(3):
        for kj in range(3):
            k = ki * 3 + kj
            term = shift(y1, ki - 1, kj - 1) * dw2_ref[:, k:k + 1]
            acc2 = term if acc2 is None else acc2 + term
    z = bn_relu(one_by_one(acc2, pw2_ref), g2_ref[...], b2_ref[...])

    o_ref[...] = z.astype(o_ref.dtype)          # single unmasked lane-dense store


# ----------------------------------------------------------------------------
# Wrapper
# ----------------------------------------------------------------------------
def _edge_masks(n, ho, wo):
    """(3, 3, n*ho*wo) f32 : mask[dh+1, dw+1] = 1 where (h+dh, w+dw) in-image."""
    def valid(size, d):
        idx = np.arange(size)
        if d > 0:
            return idx < size - d
        if d < 0:
            return idx >= -d
        return np.ones((size,), bool)

    m = np.zeros((3, 3, n, ho, wo), np.float32)
    for dh in (-1, 0, 1):
        vh = valid(ho, dh)
        for dw in (-1, 0, 1):
            vw = valid(wo, dw)
            m[dh + 1, dw + 1] = (vh[:, None] & vw[None, :]).astype(np.float32)
    return m.reshape(3, 3, n * ho * wo)


def sep_conv_forward(x_nchw, params, *, eps=_EPS):
    """SepConv forward, NCHW in -> NCHW out, one fused Pallas kernel."""
    n, c_in, h, w = x_nchw.shape
    assert h % 2 == 0 and w % 2 == 0, "stride-2 parity-plane scheme needs even H, W"
    ho, wo = h // 2, w // 2
    s = n * ho * wo
    c_out = params["pw2"].shape[1]

    xf = x_nchw.astype(jnp.float32)
    # Space-to-depth parity planes, lane-dense:
    #   xp[pi, pj, c, n*Ho*Wo + h*Wo + w] = x[n, c, 2h+pi, 2w+pj]
    xp = (xf.reshape(n, c_in, ho, 2, wo, 2)
            .transpose(3, 5, 1, 0, 2, 4)
            .reshape(2, 2, c_in, s))

    # Depthwise weights as (C_in, 9); 1x1 weights as (Co, Ci); BN params (C, 1).
    dw1 = params["dw1"].reshape(9, c_in).T
    dw2 = params["dw2"].reshape(9, c_in).T
    pw1 = params["pw1"].T                              # (C_in,  C_in)  [co, ci]
    pw2 = params["pw2"].T                              # (C_out, C_in)  [co, ci]
    g1, b1 = params["g1"][:, None], params["b1"][:, None]
    g2, b2 = params["g2"][:, None], params["b2"][:, None]
    masks = _edge_masks(n, ho, wo)

    kernel = functools.partial(_sep_conv_kernel, c_in=c_in, c_out=c_out,
                               n=n, ho=ho, wo=wo, eps=eps)
    out = pl.pallas_call(
        kernel,
        out_shape=jax.ShapeDtypeStruct((c_out, s), jnp.float32),
        in_specs=[_VMEM] * 10,
        out_specs=_VMEM,
    )(xp, masks, dw1, pw1, g1, b1, dw2, pw2, g2, b2)

    # (C_out, N*Ho*Wo) -> NCHW
    return out.reshape(c_out, n, ho, wo).transpose(1, 0, 2, 3)


# ----------------------------------------------------------------------------
# Pure-JAX reference (for correctness check)
# ----------------------------------------------------------------------------
def _reference(x_nchw, p, *, stride=2, padding=1, eps=_EPS):
    x = jnp.transpose(x_nchw, (0, 2, 3, 1))

    def dw(x, w, s):
        return lax.conv_general_dilated(
            x, w[:, :, None, :], window_strides=(s, s),
            padding=[(padding, padding), (padding, padding)],
            dimension_numbers=("NHWC", "HWIO", "NHWC"),
            feature_group_count=x.shape[-1],
            precision=lax.Precision.HIGHEST)

    def pw_bn_relu(x, w, g, b):
        y = jnp.einsum("nhwc,cd->nhwd", x, w, precision=lax.Precision.HIGHEST)
        m = jnp.mean(y, axis=(0, 1, 2), keepdims=True)
        v = jnp.mean(jnp.square(y - m), axis=(0, 1, 2), keepdims=True)
        return jnp.maximum((y - m) * lax.rsqrt(v + eps) * g + b, 0.0)

    y = pw_bn_relu(dw(x, p["dw1"], stride), p["pw1"], p["g1"], p["b1"])
    z = pw_bn_relu(dw(y, p["dw2"], 1), p["pw2"], p["g2"], p["b2"])
    return jnp.transpose(z, (0, 3, 1, 2))


# ----------------------------------------------------------------------------
# Main
# ----------------------------------------------------------------------------
if __name__ == "__main__":
    key = jax.random.PRNGKey(0)
    k_x, k_dw1, k_pw1, k_dw2, k_pw2 = jax.random.split(key, 5)

    N, C_in, H, W = 2, 4, 16, 16
    C_out = 8
    K = 3

    x = jax.random.normal(k_x, (N, C_in, H, W), dtype=jnp.float32)

    params = {
        # depthwise filters stored as (K, K, C)  (== torch weight[c, 0, ki, kj])
        "dw1": 0.2 * jax.random.normal(k_dw1, (K, K, C_in), dtype=jnp.float32),
        "dw2": 0.2 * jax.random.normal(k_dw2, (K, K, C_in), dtype=jnp.float32),
        # pointwise filters stored as (C_in, C_out) (== torch weight[o, i].T)
        "pw1": 0.2 * jax.random.normal(k_pw1, (C_in, C_in), dtype=jnp.float32),
        "pw2": 0.2 * jax.random.normal(k_pw2, (C_in, C_out), dtype=jnp.float32),
        # BatchNorm affine params (PyTorch init: weight=1, bias=0)
        "g1": jnp.ones((C_in,), jnp.float32),
        "b1": jnp.zeros((C_in,), jnp.float32),
        "g2": jnp.ones((C_out,), jnp.float32),
        "b2": jnp.zeros((C_out,), jnp.float32),
    }

    out = jax.block_until_ready(sep_conv_forward(x, params))
    ref = jax.block_until_ready(_reference(x, params, stride=2, padding=1))

    assert out.shape == (N, C_out, H // 2, W // 2), out.shape
    max_err = float(jnp.max(jnp.abs(out - ref)))
    assert jnp.allclose(out, ref, atol=1e-3, rtol=1e-3), max_err

    print("KERNEL_OK")
</pallas_src>

<mosaic_0001>
module attributes {stable_mosaic.version = 11 : i64} {
  func.func @_sep_conv_kernel(%arg0: memref<2x2x4x128xf32, #tpu.memory_space<vmem>>, %arg1: memref<3x3x128xf32, #tpu.memory_space<vmem>>, %arg2: memref<4x9xf32, #tpu.memory_space<vmem>>, %arg3: memref<4x4xf32, #tpu.memory_space<vmem>>, %arg4: memref<4x1xf32, #tpu.memory_space<vmem>>, %arg5: memref<4x1xf32, #tpu.memory_space<vmem>>, %arg6: memref<4x9xf32, #tpu.memory_space<vmem>>, %arg7: memref<8x4xf32, #tpu.memory_space<vmem>>, %arg8: memref<8x1xf32, #tpu.memory_space<vmem>>, %arg9: memref<8x1xf32, #tpu.memory_space<vmem>>, %arg10: memref<8x128xf32, #tpu.memory_space<vmem>>) attributes {dimension_semantics = [], scalar_prefetch = 0 : i64, scratch_operands = 0 : i64, tpu.core_type = #tpu.core_type<tc>} {
    %c0 = arith.constant 0 : index
    %c0_0 = arith.constant 0 : index
    %c0_1 = arith.constant 0 : index
    %c0_2 = arith.constant 0 : index
    %0 = vector.load %arg0[%c0, %c0_0, %c0_1, %c0_2] : memref<2x2x4x128xf32, #tpu.memory_space<vmem>>, vector<1x1x4x128xf32>
    %1 = vector.shape_cast %0 : vector<1x1x4x128xf32> to vector<4x128xf32>
    %c0_3 = arith.constant 0 : index
    %c1 = arith.constant 1 : index
    %c0_4 = arith.constant 0 : index
    %c0_5 = arith.constant 0 : index
    %2 = vector.load %arg0[%c0_3, %c1, %c0_4, %c0_5] : memref<2x2x4x128xf32, #tpu.memory_space<vmem>>, vector<1x1x4x128xf32>
    %3 = vector.shape_cast %2 : vector<1x1x4x128xf32> to vector<4x128xf32>
    %c1_6 = arith.constant 1 : index
    %c0_7 = arith.constant 0 : index
    %c0_8 = arith.constant 0 : index
    %c0_9 = arith.constant 0 : index
    %4 = vector.load %arg0[%c1_6, %c0_7, %c0_8, %c0_9] : memref<2x2x4x128xf32, #tpu.memory_space<vmem>>, vector<1x1x4x128xf32>
    %5 = vector.shape_cast %4 : vector<1x1x4x128xf32> to vector<4x128xf32>
    %c1_10 = arith.constant 1 : index
    %c1_11 = arith.constant 1 : index
    %c0_12 = arith.constant 0 : index
    %c0_13 = arith.constant 0 : index
    %6 = vector.load %arg0[%c1_10, %c1_11, %c0_12, %c0_13] : memref<2x2x4x128xf32, #tpu.memory_space<vmem>>, vector<1x1x4x128xf32>
    %7 = vector.shape_cast %6 : vector<1x1x4x128xf32> to vector<4x128xf32>
    %c9_i32 = arith.constant 9 : i32
    %8 = tpu.dynamic_rotate %7 by %c9_i32 dim 1 : vector<4x128xf32>, i32 -> vector<4x128xf32>
    %c0_14 = arith.constant 0 : index
    %c0_15 = arith.constant 0 : index
    %c0_16 = arith.constant 0 : index
    %9 = vector.load %arg1[%c0_14, %c0_15, %c0_16] : memref<3x3x128xf32, #tpu.memory_space<vmem>>, vector<1x1x128xf32>
    %10 = vector.shape_cast %9 : vector<1x1x128xf32> to vector<1x128xf32>
    %11 = vector.broadcast %10 : vector<1x128xf32> to vector<4x128xf32>
    %12 = arith.mulf %8, %11 : vector<4x128xf32>
    %c0_17 = arith.constant 0 : index
    %c0_18 = arith.constant 0 : index
    %13 = vector.load %arg2[%c0_17, %c0_18] : memref<4x9xf32, #tpu.memory_space<vmem>>, vector<4x1xf32>
    %14 = vector.broadcast %13 : vector<4x1xf32> to vector<4x128xf32>
    %15 = arith.mulf %12, %14 : vector<4x128xf32>
    %c8_i32 = arith.constant 8 : i32
    %16 = tpu.dynamic_rotate %5 by %c8_i32 dim 1 : vector<4x128xf32>, i32 -> vector<4x128xf32>
    %c0_19 = arith.constant 0 : index
    %c1_20 = arith.constant 1 : index
    %c0_21 = arith.constant 0 : index
    %17 = vector.load %arg1[%c0_19, %c1_20, %c0_21] : memref<3x3x128xf32, #tpu.memory_space<vmem>>, vector<1x1x128xf32>
    %18 = vector.shape_cast %17 : vector<1x1x128xf32> to vector<1x128xf32>
    %19 = vector.broadcast %18 : vector<1x128xf32> to vector<4x128xf32>
    %20 = arith.mulf %16, %19 : vector<4x128xf32>
    %c0_22 = arith.constant 0 : index
    %c1_23 = arith.constant 1 : index
    %21 = vector.load %arg2[%c0_22, %c1_23] : memref<4x9xf32, #tpu.memory_space<vmem>>, vector<4x1xf32>
    %22 = vector.broadcast %21 : vector<4x1xf32> to vector<4x128xf32>
    %23 = arith.mulf %20, %22 : vector<4x128xf32>
    %24 = arith.addf %15, %23 : vector<4x128xf32>
    %c8_i32_24 = arith.constant 8 : i32
    %25 = tpu.dynamic_rotate %7 by %c8_i32_24 dim 1 : vector<4x128xf32>, i32 -> vector<4x128xf32>
    %c0_25 = arith.constant 0 : index
    %c1_26 = arith.constant 1 : index
    %c0_27 = arith.constant 0 : index
    %26 = vector.load %arg1[%c0_25, %c1_26, %c0_27] : memref<3x3x128xf32, #tpu.memory_space<vmem>>, vector<1x1x128xf32>
    %27 = vector.shape_cast %26 : vector<1x1x128xf32> to vector<1x128xf32>
    %28 = vector.broadcast %27 : vector<1x128xf32> to vector<4x128xf32>
    %29 = arith.mulf %25, %28 : vector<4x128xf32>
    %c0_28 = arith.constant 0 : index
    %c2 = arith.constant 2 : index
    %30 = vector.load %arg2[%c0_28, %c2] : memref<4x9xf32, #tpu.memory_space<vmem>>, vector<4x1xf32>
    %31 = vector.broadcast %30 : vector<4x1xf32> to vector<4x128xf32>
    %32 = arith.mulf %29, %31 : vector<4x128xf32>
    %33 = arith.addf %24, %32 : vector<4x128xf32>
    %c1_i32 = arith.constant 1 : i32
    %34 = tpu.dynamic_rotate %3 by %c1_i32 dim 1 : vector<4x128xf32>, i32 -> vector<4x128xf32>
    %c1_29 = arith.constant 1 : index
    %c0_30 = arith.constant 0 : index
    %c0_31 = arith.constant 0 : index
    %35 = vector.load %arg1[%c1_29, %c0_30, %c0_31] : memref<3x3x128xf32, #tpu.memory_space<vmem>>, vector<1x1x128xf32>
    %36 = vector.shape_cast %35 : vector<1x1x128xf32> to vector<1x128xf32>
    %37 = vector.broadcast %36 : vector<1x128xf32> to vector<4x128xf32>
    %38 = arith.mulf %34, %37 : vector<4x128xf32>
    %c0_32 = arith.constant 0 : index
    %c3 = arith.constant 3 : index
    %39 = vector.load %arg2[%c0_32, %c3] : memref<4x9xf32, #tpu.memory_space<vmem>>, vector<4x1xf32>
    %40 = vector.broadcast %39 : vector<4x1xf32> to vector<4x128xf32>
    %41 = arith.mulf %38, %40 : vector<4x128xf32>
    %42 = arith.addf %33, %41 : vector<4x128xf32>
    %c0_33 = arith.constant 0 : index
    %c4 = arith.constant 4 : index
    %43 = vector.load %arg2[%c0_33, %c4] : memref<4x9xf32, #tpu.memory_space<vmem>>, vector<4x1xf32>
    %44 = vector.broadcast %43 : vector<4x1xf32> to vector<4x128xf32>
    %45 = arith.mulf %1, %44 : vector<4x128xf32>
    %46 = arith.addf %42, %45 : vector<4x128xf32>
    %c0_34 = arith.constant 0 : index
    %c5 = arith.constant 5 : index
    %47 = vector.load %arg2[%c0_34, %c5] : memref<4x9xf32, #tpu.memory_space<vmem>>, vector<4x1xf32>
    %48 = vector.broadcast %47 : vector<4x1xf32> to vector<4x128xf32>
    %49 = arith.mulf %3, %48 : vector<4x128xf32>
    %50 = arith.addf %46, %49 : vector<4x128xf32>
    %c1_i32_35 = arith.constant 1 : i32
    %51 = tpu.dynamic_rotate %7 by %c1_i32_35 dim 1 : vector<4x128xf32>, i32 -> vector<4x128xf32>
    %c1_36 = arith.constant 1 : index
    %c0_37 = arith.constant 0 : index
    %c0_38 = arith.constant 0 : index
    %52 = vector.load %arg1[%c1_36, %c0_37, %c0_38] : memref<3x3x128xf32, #tpu.memory_space<vmem>>, vector<1x1x128xf32>
    %53 = vector.shape_cast %52 : vector<1x1x128xf32> to vector<1x128xf32>
    %54 = vector.broadcast %53 : vector<1x128xf32> to vector<4x128xf32>
    %55 = arith.mulf %51, %54 : vector<4x128xf32>
    %c0_39 = arith.constant 0 : index
    %c6 = arith.constant 6 : index
    %56 = vector.load %arg2[%c0_39, %c6] : memref<4x9xf32, #tpu.memory_space<vmem>>, vector<4x1xf32>
    %57 = vector.broadcast %56 : vector<4x1xf32> to vector<4x128xf32>
    %58 = arith.mulf %55, %57 : vector<4x128xf32>
    %59 = arith.addf %50, %58 : vector<4x128xf32>
    %c0_40 = arith.constant 0 : index
    %c7 = arith.constant 7 : index
    %60 = vector.load %arg2[%c0_40, %c7] : memref<4x9xf32, #tpu.memory_space<vmem>>, vector<4x1xf32>
    %61 = vector.broadcast %60 : vector<4x1xf32> to vector<4x128xf32>
    %62 = arith.mulf %5, %61 : vector<4x128xf32>
    %63 = arith.addf %59, %62 : vector<4x128xf32>
    %c0_41 = arith.constant 0 : index
    %c8 = arith.constant 8 : index
    %64 = vector.load %arg2[%c0_41, %c8] : memref<4x9xf32, #tpu.memory_space<vmem>>, vector<4x1xf32>
    %65 = vector.broadcast %64 : vector<4x1xf32> to vector<4x128xf32>
    %66 = arith.mulf %7, %65 : vector<4x128xf32>
    %67 = arith.addf %63, %66 : vector<4x128xf32>
    %c0_42 = arith.constant 0 : index
    %c0_43 = arith.constant 0 : index
    %68 = vector.load %arg3[%c0_42, %c0_43] : memref<4x4xf32, #tpu.memory_space<vmem>>, vector<4x1xf32>
    %69 = vector.extract_strided_slice %67 {offsets = [0, 0], sizes = [1, 128], strides = [1, 1]} : vector<4x128xf32> to vector<1x128xf32>
    %70 = vector.broadcast %68 : vector<4x1xf32> to vector<4x128xf32>
    %71 = vector.broadcast %69 : vector<1x128xf32> to vector<4x128xf32>
    %72 = arith.mulf %70, %71 : vector<4x128xf32>
    %c0_44 = arith.constant 0 : index
    %c1_45 = arith.constant 1 : index
    %73 = vector.load %arg3[%c0_44, %c1_45] : memref<4x4xf32, #tpu.memory_space<vmem>>, vector<4x1xf32>
    %74 = vector.extract_strided_slice %67 {offsets = [1, 0], sizes = [1, 128], strides = [1, 1]} : vector<4x128xf32> to vector<1x128xf32>
    %75 = vector.broadcast %73 : vector<4x1xf32> to vector<4x128xf32>
    %76 = vector.broadcast %74 : vector<1x128xf32> to vector<4x128xf32>
    %77 = arith.mulf %75, %76 : vector<4x128xf32>
    %78 = arith.addf %72, %77 : vector<4x128xf32>
    %c0_46 = arith.constant 0 : index
    %c2_47 = arith.constant 2 : index
    %79 = vector.load %arg3[%c0_46, %c2_47] : memref<4x4xf32, #tpu.memory_space<vmem>>, vector<4x1xf32>
    %80 = vector.extract_strided_slice %67 {offsets = [2, 0], sizes = [1, 128], strides = [1, 1]} : vector<4x128xf32> to vector<1x128xf32>
    %81 = vector.broadcast %79 : vector<4x1xf32> to vector<4x128xf32>
    %82 = vector.broadcast %80 : vector<1x128xf32> to vector<4x128xf32>
    %83 = arith.mulf %81, %82 : vector<4x128xf32>
    %84 = arith.addf %78, %83 : vector<4x128xf32>
    %c0_48 = arith.constant 0 : index
    %c3_49 = arith.constant 3 : index
    %85 = vector.load %arg3[%c0_48, %c3_49] : memref<4x4xf32, #tpu.memory_space<vmem>>, vector<4x1xf32>
    %86 = vector.extract_strided_slice %67 {offsets = [3, 0], sizes = [1, 128], strides = [1, 1]} : vector<4x128xf32> to vector<1x128xf32>
    %87 = vector.broadcast %85 : vector<4x1xf32> to vector<4x128xf32>
    %88 = vector.broadcast %86 : vector<1x128xf32> to vector<4x128xf32>
    %89 = arith.mulf %87, %88 : vector<4x128xf32>
    %90 = arith.addf %84, %89 : vector<4x128xf32>
    %c0_50 = arith.constant 0 : index
    %c0_51 = arith.constant 0 : index
    %91 = vector.load %arg4[%c0_50, %c0_51] : memref<4x1xf32, #tpu.memory_space<vmem>>, vector<4x1xf32>
    %c0_52 = arith.constant 0 : index
    %c0_53 = arith.constant 0 : index
    %92 = vector.load %arg5[%c0_52, %c0_53] : memref<4x1xf32, #tpu.memory_space<vmem>>, vector<4x1xf32>
    %cst = arith.constant dense<0.000000e+00> : vector<4xf32>
    %93 = vector.multi_reduction <add>, %90, %cst [1] : vector<4x128xf32> to vector<4xf32>
    %94 = vector.shape_cast %93 : vector<4xf32> to vector<4x1xf32>
    %95 = arith.mulf %90, %90 : vector<4x128xf32>
    %cst_54 = arith.constant dense<0.000000e+00> : vector<4xf32>
    %96 = vector.multi_reduction <add>, %95, %cst_54 [1] : vector<4x128xf32> to vector<4xf32>
    %97 = vector.shape_cast %96 : vector<4xf32> to vector<4x1xf32>
    %cst_55 = arith.constant 7.812500e-03 : f32
    %98 = vector.broadcast %cst_55 : f32 to vector<4x1xf32>
    %99 = arith.mulf %94, %98 : vector<4x1xf32>
    %cst_56 = arith.constant 7.812500e-03 : f32
    %100 = vector.broadcast %cst_56 : f32 to vector<4x1xf32>
    %101 = arith.mulf %97, %100 : vector<4x1xf32>
    %102 = arith.mulf %99, %99 : vector<4x1xf32>
    %103 = arith.subf %101, %102 : vector<4x1xf32>
    %cst_57 = arith.constant 9.99999974E-6 : f32
    %104 = vector.broadcast %cst_57 : f32 to vector<4x1xf32>
    %105 = arith.addf %103, %104 : vector<4x1xf32>
    %106 = math.rsqrt %105 : vector<4x1xf32>
    %107 = vector.broadcast %99 : vector<4x1xf32> to vector<4x128xf32>
    %108 = arith.subf %90, %107 : vector<4x128xf32>
    %109 = arith.mulf %106, %91 : vector<4x1xf32>
    %110 = vector.broadcast %109 : vector<4x1xf32> to vector<4x128xf32>
    %111 = arith.mulf %108, %110 : vector<4x128xf32>
    %112 = vector.broadcast %92 : vector<4x1xf32> to vector<4x128xf32>
    %113 = arith.addf %111, %112 : vector<4x128xf32>
    %cst_58 = arith.constant 0.000000e+00 : f32
    %114 = vector.broadcast %cst_58 : f32 to vector<4x128xf32>
    %115 = arith.maximumf %113, %114 : vector<4x128xf32>
    %c9_i32_59 = arith.constant 9 : i32
    %116 = tpu.dynamic_rotate %115 by %c9_i32_59 dim 1 : vector<4x128xf32>, i32 -> vector<4x128xf32>
    %c0_60 = arith.constant 0 : index
    %c0_61 = arith.constant 0 : index
    %c0_62 = arith.constant 0 : index
    %117 = vector.load %arg1[%c0_60, %c0_61, %c0_62] : memref<3x3x128xf32, #tpu.memory_space<vmem>>, vector<1x1x128xf32>
    %118 = vector.shape_cast %117 : vector<1x1x128xf32> to vector<1x128xf32>
    %119 = vector.broadcast %118 : vector<1x128xf32> to vector<4x128xf32>
    %120 = arith.mulf %116, %119 : vector<4x128xf32>
    %c0_63 = arith.constant 0 : index
    %c0_64 = arith.constant 0 : index
    %121 = vector.load %arg6[%c0_63, %c0_64] : memref<4x9xf32, #tpu.memory_space<vmem>>, vector<4x1xf32>
    %122 = vector.broadcast %121 : vector<4x1xf32> to vector<4x128xf32>
    %123 = arith.mulf %120, %122 : vector<4x128xf32>
    %c8_i32_65 = arith.constant 8 : i32
    %124 = tpu.dynamic_rotate %115 by %c8_i32_65 dim 1 : vector<4x128xf32>, i32 -> vector<4x128xf32>
    %c0_66 = arith.constant 0 : index
    %c1_67 = arith.constant 1 : index
    %c0_68 = arith.constant 0 : index
    %125 = vector.load %arg1[%c0_66, %c1_67, %c0_68] : memref<3x3x128xf32, #tpu.memory_space<vmem>>, vector<1x1x128xf32>
    %126 = vector.shape_cast %125 : vector<1x1x128xf32> to vector<1x128xf32>
    %127 = vector.broadcast %126 : vector<1x128xf32> to vector<4x128xf32>
    %128 = arith.mulf %124, %127 : vector<4x128xf32>
    %c0_69 = arith.constant 0 : index
    %c1_70 = arith.constant 1 : index
    %129 = vector.load %arg6[%c0_69, %c1_70] : memref<4x9xf32, #tpu.memory_space<vmem>>, vector<4x1xf32>
    %130 = vector.broadcast %129 : vector<4x1xf32> to vector<4x128xf32>
    %131 = arith.mulf %128, %130 : vector<4x128xf32>
    %132 = arith.addf %123, %131 : vector<4x128xf32>
    %c7_i32 = arith.constant 7 : i32
    %133 = tpu.dynamic_rotate %115 by %c7_i32 dim 1 : vector<4x128xf32>, i32 -> vector<4x128xf32>
    %c0_71 = arith.constant 0 : index
    %c2_72 = arith.constant 2 : index
    %c0_73 = arith.constant 0 : index
    %134 = vector.load %arg1[%c0_71, %c2_72, %c0_73] : memref<3x3x128xf32, #tpu.memory_space<vmem>>, vector<1x1x128xf32>
    %135 = vector.shape_cast %134 : vector<1x1x128xf32> to vector<1x128xf32>
    %136 = vector.broadcast %135 : vector<1x128xf32> to vector<4x128xf32>
    %137 = arith.mulf %133, %136 : vector<4x128xf32>
    %c0_74 = arith.constant 0 : index
    %c2_75 = arith.constant 2 : index
    %138 = vector.load %arg6[%c0_74, %c2_75] : memref<4x9xf32, #tpu.memory_space<vmem>>, vector<4x1xf32>
    %139 = vector.broadcast %138 : vector<4x1xf32> to vector<4x128xf32>
    %140 = arith.mulf %137, %139 : vector<4x128xf32>
    %141 = arith.addf %132, %140 : vector<4x128xf32>
    %c1_i32_76 = arith.constant 1 : i32
    %142 = tpu.dynamic_rotate %115 by %c1_i32_76 dim 1 : vector<4x128xf32>, i32 -> vector<4x128xf32>
    %c1_77 = arith.constant 1 : index
    %c0_78 = arith.constant 0 : index
    %c0_79 = arith.constant 0 : index
    %143 = vector.load %arg1[%c1_77, %c0_78, %c0_79] : memref<3x3x128xf32, #tpu.memory_space<vmem>>, vector<1x1x128xf32>
    %144 = vector.shape_cast %143 : vector<1x1x128xf32> to vector<1x128xf32>
    %145 = vector.broadcast %144 : vector<1x128xf32> to vector<4x128xf32>
    %146 = arith.mulf %142, %145 : vector<4x128xf32>
    %c0_80 = arith.constant 0 : index
    %c3_81 = arith.constant 3 : index
    %147 = vector.load %arg6[%c0_80, %c3_81] : memref<4x9xf32, #tpu.memory_space<vmem>>, vector<4x1xf32>
    %148 = vector.broadcast %147 : vector<4x1xf32> to vector<4x128xf32>
    %149 = arith.mulf %146, %148 : vector<4x128xf32>
    %150 = arith.addf %141, %149 : vector<4x128xf32>
    %c0_82 = arith.constant 0 : index
    %c4_83 = arith.constant 4 : index
    %151 = vector.load %arg6[%c0_82, %c4_83] : memref<4x9xf32, #tpu.memory_space<vmem>>, vector<4x1xf32>
    %152 = vector.broadcast %151 : vector<4x1xf32> to vector<4x128xf32>
    %153 = arith.mulf %115, %152 : vector<4x128xf32>
    %154 = arith.addf %150, %153 : vector<4x128xf32>
    %c127_i32 = arith.constant 127 : i32
    %155 = tpu.dynamic_rotate %115 by %c127_i32 dim 1 : vector<4x128xf32>, i32 -> vector<4x128xf32>
    %c1_84 = arith.constant 1 : index
    %c2_85 = arith.constant 2 : index
    %c0_86 = arith.constant 0 : index
    %156 = vector.load %arg1[%c1_84, %c2_85, %c0_86] : memref<3x3x128xf32, #tpu.memory_space<vmem>>, vector<1x1x128xf32>
    %157 = vector.shape_cast %156 : vector<1x1x128xf32> to vector<1x128xf32>
    %158 = vector.broadcast %157 : vector<1x128xf32> to vector<4x128xf32>
    %159 = arith.mulf %155, %158 : vector<4x128xf32>
    %c0_87 = arith.constant 0 : index
    %c5_88 = arith.constant 5 : index
    %160 = vector.load %arg6[%c0_87, %c5_88] : memref<4x9xf32, #tpu.memory_space<vmem>>, vector<4x1xf32>
    %161 = vector.broadcast %160 : vector<4x1xf32> to vector<4x128xf32>
    %162 = arith.mulf %159, %161 : vector<4x128xf32>
    %163 = arith.addf %154, %162 : vector<4x128xf32>
    %c121_i32 = arith.constant 121 : i32
    %164 = tpu.dynamic_rotate %115 by %c121_i32 dim 1 : vector<4x128xf32>, i32 -> vector<4x128xf32>
    %c2_89 = arith.constant 2 : index
    %c0_90 = arith.constant 0 : index
    %c0_91 = arith.constant 0 : index
    %165 = vector.load %arg1[%c2_89, %c0_90, %c0_91] : memref<3x3x128xf32, #tpu.memory_space<vmem>>, vector<1x1x128xf32>
    %166 = vector.shape_cast %165 : vector<1x1x128xf32> to vector<1x128xf32>
    %167 = vector.broadcast %166 : vector<1x128xf32> to vector<4x128xf32>
    %168 = arith.mulf %164, %167 : vector<4x128xf32>
    %c0_92 = arith.constant 0 : index
    %c6_93 = arith.constant 6 : index
    %169 = vector.load %arg6[%c0_92, %c6_93] : memref<4x9xf32, #tpu.memory_space<vmem>>, vector<4x1xf32>
    %170 = vector.broadcast %169 : vector<4x1xf32> to vector<4x128xf32>
    %171 = arith.mulf %168, %170 : vector<4x128xf32>
    %172 = arith.addf %163, %171 : vector<4x128xf32>
    %c120_i32 = arith.constant 120 : i32
    %173 = tpu.dynamic_rotate %115 by %c120_i32 dim 1 : vector<4x128xf32>, i32 -> vector<4x128xf32>
    %c2_94 = arith.constant 2 : index
    %c1_95 = arith.constant 1 : index
    %c0_96 = arith.constant 0 : index
    %174 = vector.load %arg1[%c2_94, %c1_95, %c0_96] : memref<3x3x128xf32, #tpu.memory_space<vmem>>, vector<1x1x128xf32>
    %175 = vector.shape_cast %174 : vector<1x1x128xf32> to vector<1x128xf32>
    %176 = vector.broadcast %175 : vector<1x128xf32> to vector<4x128xf32>
    %177 = arith.mulf %173, %176 : vector<4x128xf32>
    %c0_97 = arith.constant 0 : index
    %c7_98 = arith.constant 7 : index
    %178 = vector.load %arg6[%c0_97, %c7_98] : memref<4x9xf32, #tpu.memory_space<vmem>>, vector<4x1xf32>
    %179 = vector.broadcast %178 : vector<4x1xf32> to vector<4x128xf32>
    %180 = arith.mulf %177, %179 : vector<4x128xf32>
    %181 = arith.addf %172, %180 : vector<4x128xf32>
    %c119_i32 = arith.constant 119 : i32
    %182 = tpu.dynamic_rotate %115 by %c119_i32 dim 1 : vector<4x128xf32>, i32 -> vector<4x128xf32>
    %c2_99 = arith.constant 2 : index
    %c2_100 = arith.constant 2 : index
    %c0_101 = arith.constant 0 : index
    %183 = vector.load %arg1[%c2_99, %c2_100, %c0_101] : memref<3x3x128xf32, #tpu.memory_space<vmem>>, vector<1x1x128xf32>
    %184 = vector.shape_cast %183 : vector<1x1x128xf32> to vector<1x128xf32>
    %185 = vector.broadcast %184 : vector<1x128xf32> to vector<4x128xf32>
    %186 = arith.mulf %182, %185 : vector<4x128xf32>
    %c0_102 = arith.constant 0 : index
    %c8_103 = arith.constant 8 : index
    %187 = vector.load %arg6[%c0_102, %c8_103] : memref<4x9xf32, #tpu.memory_space<vmem>>, vector<4x1xf32>
    %188 = vector.broadcast %187 : vector<4x1xf32> to vector<4x128xf32>
    %189 = arith.mulf %186, %188 : vector<4x128xf32>
    %190 = arith.addf %181, %189 : vector<4x128xf32>
    %c0_104 = arith.constant 0 : index
    %c0_105 = arith.constant 0 : index
    %191 = vector.load %arg7[%c0_104, %c0_105] : memref<8x4xf32, #tpu.memory_space<vmem>>, vector<8x1xf32>
    %192 = vector.extract_strided_slice %190 {offsets = [0, 0], sizes = [1, 128], strides = [1, 1]} : vector<4x128xf32> to vector<1x128xf32>
    %193 = vector.broadcast %191 : vector<8x1xf32> to vector<8x128xf32>
    %194 = vector.broadcast %192 : vector<1x128xf32> to vector<8x128xf32>
    %195 = arith.mulf %193, %194 : vector<8x128xf32>
    %c0_106 = arith.constant 0 : index
    %c1_107 = arith.constant 1 : index
    %196 = vector.load %arg7[%c0_106, %c1_107] : memref<8x4xf32, #tpu.memory_space<vmem>>, vector<8x1xf32>
    %197 = vector.extract_strided_slice %190 {offsets = [1, 0], sizes = [1, 128], strides = [1, 1]} : vector<4x128xf32> to vector<1x128xf32>
    %198 = vector.broadcast %196 : vector<8x1xf32> to vector<8x128xf32>
    %199 = vector.broadcast %197 : vector<1x128xf32> to vector<8x128xf32>
    %200 = arith.mulf %198, %199 : vector<8x128xf32>
    %201 = arith.addf %195, %200 : vector<8x128xf32>
    %c0_108 = arith.constant 0 : index
    %c2_109 = arith.constant 2 : index
    %202 = vector.load %arg7[%c0_108, %c2_109] : memref<8x4xf32, #tpu.memory_space<vmem>>, vector<8x1xf32>
    %203 = vector.extract_strided_slice %190 {offsets = [2, 0], sizes = [1, 128], strides = [1, 1]} : vector<4x128xf32> to vector<1x128xf32>
    %204 = vector.broadcast %202 : vector<8x1xf32> to vector<8x128xf32>
    %205 = vector.broadcast %203 : vector<1x128xf32> to vector<8x128xf32>
    %206 = arith.mulf %204, %205 : vector<8x128xf32>
    %207 = arith.addf %201, %206 : vector<8x128xf32>
    %c0_110 = arith.constant 0 : index
    %c3_111 = arith.constant 3 : index
    %208 = vector.load %arg7[%c0_110, %c3_111] : memref<8x4xf32, #tpu.memory_space<vmem>>, vector<8x1xf32>
    %209 = vector.extract_strided_slice %190 {offsets = [3, 0], sizes = [1, 128], strides = [1, 1]} : vector<4x128xf32> to vector<1x128xf32>
    %210 = vector.broadcast %208 : vector<8x1xf32> to vector<8x128xf32>
    %211 = vector.broadcast %209 : vector<1x128xf32> to vector<8x128xf32>
    %212 = arith.mulf %210, %211 : vector<8x128xf32>
    %213 = arith.addf %207, %212 : vector<8x128xf32>
    %c0_112 = arith.constant 0 : index
    %c0_113 = arith.constant 0 : index
    %214 = vector.load %arg8[%c0_112, %c0_113] : memref<8x1xf32, #tpu.memory_space<vmem>>, vector<8x1xf32>
    %c0_114 = arith.constant 0 : index
    %c0_115 = arith.constant 0 : index
    %215 = vector.load %arg9[%c0_114, %c0_115] : memref<8x1xf32, #tpu.memory_space<vmem>>, vector<8x1xf32>
    %cst_116 = arith.constant dense<0.000000e+00> : vector<8xf32>
    %216 = vector.multi_reduction <add>, %213, %cst_116 [1] : vector<8x128xf32> to vector<8xf32>
    %217 = vector.shape_cast %216 : vector<8xf32> to vector<8x1xf32>
    %218 = arith.mulf %213, %213 : vector<8x128xf32>
    %cst_117 = arith.constant dense<0.000000e+00> : vector<8xf32>
    %219 = vector.multi_reduction <add>, %218, %cst_117 [1] : vector<8x128xf32> to vector<8xf32>
    %220 = vector.shape_cast %219 : vector<8xf32> to vector<8x1xf32>
    %cst_118 = arith.constant 7.812500e-03 : f32
    %221 = vector.broadcast %cst_118 : f32 to vector<8x1xf32>
    %222 = arith.mulf %217, %221 : vector<8x1xf32>
    %cst_119 = arith.constant 7.812500e-03 : f32
    %223 = vector.broadcast %cst_119 : f32 to vector<8x1xf32>
    %224 = arith.mulf %220, %223 : vector<8x1xf32>
    %225 = arith.mulf %222, %222 : vector<8x1xf32>
    %226 = arith.subf %224, %225 : vector<8x1xf32>
    %cst_120 = arith.constant 9.99999974E-6 : f32
    %227 = vector.broadcast %cst_120 : f32 to vector<8x1xf32>
    %228 = arith.addf %226, %227 : vector<8x1xf32>
    %229 = math.rsqrt %228 : vector<8x1xf32>
    %230 = vector.broadcast %222 : vector<8x1xf32> to vector<8x128xf32>
    %231 = arith.subf %213, %230 : vector<8x128xf32>
    %232 = arith.mulf %229, %214 : vector<8x1xf32>
    %233 = vector.broadcast %232 : vector<8x1xf32> to vector<8x128xf32>
    %234 = arith.mulf %231, %233 : vector<8x128xf32>
    %235 = vector.broadcast %215 : vector<8x1xf32> to vector<8x128xf32>
    %236 = arith.addf %234, %235 : vector<8x128xf32>
    %cst_121 = arith.constant 0.000000e+00 : f32
    %237 = vector.broadcast %cst_121 : f32 to vector<8x128xf32>
    %238 = arith.maximumf %236, %237 : vector<8x128xf32>
    %c0_122 = arith.constant 0 : index
    %c0_123 = arith.constant 0 : index
    %239 = vector.load %arg10[%c0_122, %c0_123] : memref<8x128xf32, #tpu.memory_space<vmem>>, vector<8x128xf32>
    tpu.vector_store %arg10[%c0_122, %c0_123], %238 {strides = array<i32>} : memref<8x128xf32, #tpu.memory_space<vmem>>, vector<8x128xf32>,
    return
  }
}

</mosaic_0001>

<bundles_post_ra>
// kernel: tpu_custom_call.1
= control target key start
LH: loop header
LB: loop body
LE: loop exit
PB: predicated region body
PF: predicated region fallthrough
CT: control target
= control target key end

     0   :  { %15 = vsyncpa [#allocation3], 0  ;;  %s704_s0 = inlined_call_operand.vmem [shape: f32[2,2,4,128], index: 0, kind: input, shape index: {}]   ;;  %s705_s1 = inlined_call_operand.vmem [shape: f32[3,3,128], index: 1, kind: input, shape index: {}]   ;;  %s706_s2 = inlined_call_operand.vmem [shape: f32[4,9], index: 2, kind: input, shape index: {}]   ;;  %s707_s3 = inlined_call_operand.hbm [shape: f32[4,4], index: 3, kind: input, shape index: {}]   ;;  %s708_s4 = inlined_call_operand.vmem [shape: f32[4,1], index: 4, kind: input, shape index: {}]   ;;  %s709_s5 = inlined_call_operand.vmem [shape: f32[4,1], index: 5, kind: input, shape index: {}]   ;;  %s710_s6 = inlined_call_operand.vmem [shape: f32[4,9], index: 6, kind: input, shape index: {}]   ;;  %s711_s7 = inlined_call_operand.vmem [shape: f32[8,4], index: 7, kind: input, shape index: {}]   ;;  %s712_s8 = inlined_call_operand.vmem [shape: f32[8,1], index: 8, kind: input, shape index: {}]   ;;  %s713_s9 = inlined_call_operand.vmem [shape: f32[8,1], index: 9, kind: input, shape index: {}]   ;;  %s714_s10 = inlined_call_operand.hbm [shape: f32[8,128], index: 10, kind: output, shape index: {}]  }
   0x1   :  { %16 = vsyncpa [#allocation4], 0  ;;  %s28_s15 = sshll.u32 %s707_s3, 4  ;;  %s496_s16 = smov [#allocation2]   ;;  %s29_s15 = int_to_ptr.hbm [resolvable:$true] %s28_s15 }
   0x2   :  { %s30_s17 = sshll.u32 %s496_s16, 4  ;;  %s31_s17 = int_to_ptr.vmem [resolvable:$true] %s30_s17 }
   0x3   :  { %33 = dma.hbm_to_vmem [thread:$0]  %s29_s15, 64, %s31_s17, [#allocation3]  }
   0x4   :  { %492 = dma.done.wait [#allocation3], 64  }
   0x5   :  { %493 = vsyncadd [#allocation3], 4294967232  ;;  %v497_v0 = vmov 0   ;;  %v498_v1 = vmov 5   ;;  %v499_v2 = vmov 2   ;;  %s500_s21 = smov 9  }
   0x6   :  { %404 = vset.pattern.permute.xlu1 %v497_v0  ;;  %409 = vset.pattern.permute.xlu0 %v498_v1  ;;  %v62_v3 = vld [vmem:[%s706_s2] sm:$0xf]  ;;  %v582_v4 = vld [vmem:[%s704_s0 + $0xc] sm:$0xf]  ;;  %s501_s22 = smov 8   ;;  %v502_v6 = vmov 1  }
   0x7   :  { %406 = vset.pattern.permute.xlu2 %v499_v2  ;;  %65 = vperm.xlu1 %404, %v62_v3   ;;  %v591_v5 = vld [vmem:[%s704_s0 + $0x8] sm:$0xf]  ;;  %v377_v7 = vld [vmem:[%s704_s0 + $0x4] sm:$0xf]  ;;  %s503_s26 = smov 1   ;;  %v504_v8 = vmov 3  }
   0x8   :  { %57 = vrot.lane.b32.xlu0 %v582_v4, %s500_s21  ;;  %80 = vrot.lane.b32.xlu2 %v582_v4, %s501_s22  ;;  %v505_v9 = vmov 4   ;;  %v506_v10 = vmov 6   ;;  %v507_v11 = vmov 7   ;;  %v134_v12 = vld [vmem:[#allocation2] sm:$0xf]  ;;  %v508_v13 = vmov 8  }
   0x9   :  { %v617_v20 = vld [vmem:[%s705_s1 + $0x1] ss:$0 sm:$0xff]  ;;  %v622_v21 = vld [vmem:[%s705_s1] ss:$0 sm:$0xff]  ;;  %v629_v25 = vld [vmem:[%s705_s1 + $0x4] ss:$0 sm:$0xff] }
   0xa   :  { %v50_v35 = vld [vmem:[%s704_s0] sm:$0xf]  ;;  %vm165_vm0 = vcmask 1043456   ;;  %s509_s18 = smov 119   ;;  %s511_s20 = smov 127  }
   0xb   :  { %v164_v43 = vld [vmem:[%s709_s5] sm:$0xf]  ;;  %s514_s14 = smov [#allocation5]  }
   0xc   :  { %s365_s15 = sshll.u32 %s514_s14, 4  ;;  %s366_s15 = int_to_ptr.vmem [resolvable:$true] %s365_s15 }
   0xf   :  { %405 = vset.pattern.permute.xlu1 %v502_v6 }
  0x10   :  { %69 = vrot.lane.b32.xlu0 %v591_v5, %s501_s22  ;;  %75 = vperm.xlu1 %405, %v62_v3  }
  0x11   :  { %84 = vperm.xlu2 %406, %v62_v3  }
  0x18   :  { %89 = vrot.lane.b32.xlu0 %v377_v7, %s503_s26  ;;  %407 = vset.pattern.permute.xlu1 %v504_v8 }
  0x19   :  { %408 = vset.pattern.permute.xlu2 %v505_v9  ;;  %96 = vperm.xlu1 %407, %v62_v3  }
  0x1a   :  { %102 = vperm.xlu2 %408, %v62_v3  }
  0x20   :  { %108 = vperm.xlu0 %409, %v62_v3  }
  0x21   :  { %113 = vrot.lane.b32.xlu1 %v582_v4, %s503_s26 }
  0x22   :  { %410 = vset.pattern.permute.xlu2 %v506_v10  ;;  %411 = vset.pattern.permute.xlu1 %v507_v11 }
  0x23   :  { %117 = vperm.xlu2 %410, %v62_v3  }
  0x28   :  { %413 = vset.pattern.permute.xlu0 %v497_v0 }
  0x29   :  { %137 = vperm.xlu0 %413, %v134_v12   ;;  %123 = vperm.xlu1 %411, %v62_v3  }
  0x2b   :  { %412 = vset.pattern.permute.xlu2 %v508_v13 }
  0x2c   :  { %129 = vperm.xlu2 %412, %v62_v3  }
  0x31   :  { %419 = vset.pattern.permute.xlu0 %v499_v2  ;;  %414 = vset.pattern.permute.xlu1 %v502_v6 }
  0x32   :  { %143 = vperm.xlu1 %414, %v134_v12  }
  0x34   :  { %415 = vset.pattern.permute.xlu2 %v499_v2 }
  0x35   :  { %150 = vperm.xlu2 %415, %v134_v12  }
  0x3a   :  { %416 = vset.pattern.permute.xlu1 %v504_v8 }
  0x3b   :  { %157 = vperm.xlu1 %416, %v134_v12  }
  0x3d   :  { %418 = vset.pattern.permute.xlu2 %v502_v6 }
  0x43   :  { %417 = vset.pattern.permute.xlu1 %v497_v0 }
  0x44   :  { %198 = vperm.xlu1 %417, %v164_v43  }
  0x62   :  { %v81_v14 = vpop.permute.xlu2 %80 }
  0x63   :  { %v82_v29 = vmul.f32 %v617_v20, %v81_v14 }
  0x6b   :  { %v85_v17 = vpop.permute.xlu2 %84 }
  0x6c   :  { %v87_v33 = vmul.f32 %v85_v17, %v82_v29 }
  0x74   :  { %v103_v23 = vpop.permute.xlu2 %102 }
  0x75   :  { %v105_v41 = vmul.f32 %v103_v23, %v50_v35 }
  0x79   :  { %v66_v15 = vpop.permute.xlu1 %65 }
  0x7a   :  { %v58_v16 = vpop.permute.xlu0 %57 }
  0x7b   :  { %v61_v24 = vmul.f32 %v622_v21, %v58_v16 }
  0x7d   :  { %v68_v30 = vmul.f32 %v66_v15, %v61_v24  ;;  %v118_v36 = vpop.permute.xlu2 %117 }
  0x82   :  { %v70_v18 = vpop.permute.xlu0 %69  ;;  %v76_v19 = vpop.permute.xlu1 %75 }
  0x83   :  { %v73_v22 = vmul.f32 %v617_v20, %v70_v18  ;;  %v645_v18 = vld [vmem:[%s710_s6] sm:$0xf] }
  0x84   :  { %209 = vperm.xlu1 %417, %v645_v18  }
  0x85   :  { %v78_v27 = vmul.f32 %v76_v19, %v73_v22 }
  0x86   :  { %v130_v49 = vpop.permute.xlu2 %129 }
  0x87   :  { %v79_v32 = vadd.f32 %v78_v27, %v68_v30  ;;  %v132_v52 = vmul.f32 %v582_v4, %v130_v49  ;;  %v163_v30 = vld [vmem:[%s708_s4] sm:$0xf]  ;;  %s510_s4 = smov 7  }
  0x89   :  { %v88_v37 = vadd.f32 %v87_v33, %v79_v32 }
  0x8a   :  { %v90_v26 = vpop.permute.xlu0 %89 }
  0x8b   :  { %v97_v28 = vpop.permute.xlu1 %96  ;;  %v94_v31 = vmul.f32 %v629_v25, %v90_v26 }
  0x8c   :  { %420 = vset.pattern.permute.xlu1 %v504_v8 }
  0x8d   :  { %v99_v34 = vmul.f32 %v97_v28, %v94_v31  ;;  %237 = vperm.xlu1 %420, %v645_v18  }
  0x8f   :  { %v100_v40 = vadd.f32 %v99_v34, %v88_v37  ;;  %v151_v62 = vpop.permute.xlu2 %150 }
  0x91   :  { %v106_v45 = vadd.f32 %v105_v41, %v100_v40 }
  0x92   :  { %v109_v38 = vpop.permute.xlu0 %108 }
  0x93   :  { %v114_v39 = vpop.permute.xlu1 %113  ;;  %v111_v44 = vmul.f32 %v377_v7, %v109_v38 }
  0x94   :  { %v115_v42 = vmul.f32 %v629_v25, %v114_v39 }
  0x95   :  { %v112_v47 = vadd.f32 %v111_v44, %v106_v45  ;;  %425 = vset.pattern.permute.xlu1 %v497_v0 }
  0x96   :  { %v120_v46 = vmul.f32 %v118_v36, %v115_v42 }
  0x98   :  { %v121_v50 = vadd.f32 %v120_v46, %v112_v47 }
  0x9b   :  { %v124_v48 = vpop.permute.xlu1 %123  ;;  %v138_v57 = vpop.permute.xlu0 %137 }
  0x9c   :  { %v126_v51 = vmul.f32 %v591_v5, %v124_v48 }
  0x9e   :  { %v127_v53 = vadd.f32 %v126_v51, %v121_v50 }
  0xa0   :  { %v133_v54 = vadd.f32 %v132_v52, %v127_v53 }
  0xa2   :  { %v140_v55 = vperm.slane %v133_v54, 0  ;;  %v146_v56 = vperm.slane %v133_v54, 1  ;;  %v153_v61 = vperm.slane %v133_v54, 2  ;;  %v160_v7 = vperm.slane %v133_v54, 3 }
  0xa4   :  { %v144_v58 = vpop.permute.xlu1 %143  ;;  %v141_v59 = vmul.f32 %v140_v55, %v138_v57  ;;  %v154_v3 = vmul.f32 %v153_v61, %v151_v62  ;;  %v437_v57 = vld [vmem:[%s705_s1 + $0x6] ss:$0 sm:$0xff] }
  0xa5   :  { %v147_v60 = vmul.f32 %v146_v56, %v144_v58 }
  0xa7   :  { %v148_v63 = vadd.f32 %v147_v60, %v141_v59 }
  0xa9   :  { %v155_v14 = vadd.f32 %v154_v3, %v148_v63 }
  0xad   :  { %v158_v12 = vpop.permute.xlu1 %157 }
  0xae   :  { %v161_v15 = vmul.f32 %v160_v7, %v158_v12 }
  0xb0   :  { %v162_v5 = vadd.f32 %v161_v15, %v155_v14  ;;  %v435_v15 = vld [vmem:[%s705_s1 + $0xa] ss:$0 sm:$0xff] }
  0xb2   :  { %v166_v16 = vsel %vm165_vm0, %v162_v5, 0.0  ;;  %v169_v4 = vmul.f32 %v162_v5, %v162_v5 }
  0xb3   :  { %167 = vadd.xlane.f32.xlu2 %v166_v16 }
  0xb4   :  { %v170_v17 = vsel %vm165_vm0, %v169_v4, 0.0 }
  0xb5   :  { %171 = vadd.xlane.f32.xlu0 %v170_v17 }
  0xb6   :  { %v199_v33 = vpop.permute.xlu1 %198 }
  0xc9   :  { %228 = vperm.xlu0 %419, %v645_v18  }
  0xcb   :  { %217 = vperm.xlu2 %418, %v645_v18  }
  0xd1   :  { %428 = vset.pattern.permute.xlu0 %v502_v6 }
  0xd3   :  { %421 = vset.pattern.permute.xlu2 %v505_v9 }
  0xd4   :  { %243 = vperm.xlu2 %421, %v645_v18  }
  0xdc   :  { %422 = vset.pattern.permute.xlu2 %v498_v1 }
  0xdd   :  { %254 = vperm.xlu2 %422, %v645_v18  }
  0xe5   :  { %423 = vset.pattern.permute.xlu2 %v506_v10 }
  0xe6   :  { %266 = vperm.xlu2 %423, %v645_v18  }
  0xee   :  { %424 = vset.pattern.permute.xlu2 %v507_v11 }
  0xef   :  { %277 = vperm.xlu2 %424, %v645_v18  }
  0xf6   :  { %v210_v34 = vpop.permute.xlu1 %209 }
  0xf7   :  { %427 = vset.pattern.permute.xlu2 %v497_v0 }
  0xff   :  { %v238_v35 = vpop.permute.xlu1 %237 }
 0x126   :  { %v168_v19 = vpop.xlane.xlu2 %167 }
 0x127   :  { %v173_v22 = vmul.f32 0.0078125, %v168_v19 }
 0x128   :  { %v172_v23 = vpop.xlane.xlu0 %171 }
 0x129   :  { %v175_v9 = vmul.f32 %v173_v22, %v173_v22  ;;  %v174_v24 = vmul.f32 0.0078125, %v172_v23  ;;  %v188_v36 = vsub.f32 %v162_v5, %v173_v22 }
 0x12b   :  { %v176_v26 = vsub.f32 %v174_v24, %v175_v9 }
 0x12d   :  { %v177_v27 = vadd.f32 1e-05, %v176_v26 }
 0x12e   :  { %v218_v42 = vpop.permute.xlu2 %217 }
 0x12f   :  { %440 = vrsqrt.f32 %v177_v27  ;;  %vm184_vm2 = vweird.f32 %v177_v27 }
 0x135   :  { %v441_v6 = vpop.eup %440 }
 0x136   :  { %v179_v1 = vmul.f32 %v441_v6, %v177_v27  ;;  %vm185_vm1 = vweird.f32 %v441_v6  ;;  %v244_v45 = vpop.permute.xlu2 %243 }
 0x137   :  { %vm186_vm3 = vmor %vm184_vm2, %vm185_vm1 }
 0x138   :  { %v180_v28 = vmul.f32 %v441_v6, %v179_v1 }
 0x13a   :  { %v181_v10 = vmul.f32 0.5, %v180_v28 }
 0x13b   :  { %v229_v53 = vpop.permute.xlu0 %228 }
 0x13c   :  { %v182_v29 = vsub.f32 1.5, %v181_v10 }
 0x13e   :  { %v183_v31 = vmul.f32 %v441_v6, %v182_v29  ;;  %v255_v47 = vpop.permute.xlu2 %254 }
 0x140   :  { %v187_v11 = vsel %vm186_vm3, %v441_v6, %v183_v31 }
 0x141   :  { %v189_v32 = vmul.f32 %v187_v11, %v163_v30 }
 0x143   :  { %192 = vperm.xlu1 %425, %v189_v32  }
 0x146   :  { %v267_v49 = vpop.permute.xlu2 %266 }
 0x14b   :  { %426 = vset.pattern.permute.xlu1 %v508_v13  ;;  %v293_v13 = vld [vmem:[%s711_s7] sm:$0xff] }
 0x14c   :  { %296 = vperm.xlu2 %427, %v293_v13  }
 0x14e   :  { %v278_v61 = vpop.permute.xlu2 %277 }
 0x154   :  { %430 = vset.pattern.permute.xlu2 %v504_v8 }
 0x155   :  { %316 = vperm.xlu2 %430, %v293_v13  }
 0x1a6   :  { %v297_v23 = vpop.permute.xlu2 %296 }
 0x1af   :  { %v317_v32 = vpop.permute.xlu2 %316 }
 0x1b5   :  { %v193_v37 = vpop.permute.xlu1 %192 }
 0x1b6   :  { %v195_v38 = vmul.f32 %v193_v37, %v188_v36 }
 0x1b8   :  { %v201_v39 = vadd.f32 %v199_v33, %v195_v38 }
 0x1ba   :  { %v202_v40 = vmax.f32 %v201_v39, 0.0 }
 0x1bc   :  { %282 = vrot.lane.b32.xlu0 %v202_v40, %s509_s18  ;;  %203 = vrot.lane.b32.xlu1 %v202_v40, %s500_s21  ;;  %s512_s21 = smov 121   ;;  %v246_v7 = vmul.f32 %v244_v45, %v202_v40 }
 0x1c4   :  { %213 = vrot.lane.b32.xlu1 %v202_v40, %s501_s22  ;;  %302 = vperm.xlu0 %428, %v293_v13   ;;  %s513_s22 = smov 120  }
 0x1cc   :  { %222 = vrot.lane.b32.xlu1 %v202_v40, %s510_s4  ;;  %431 = vset.pattern.permute.xlu0 %v497_v0  ;;  %v436_v0 = vld [vmem:[%s705_s1 + $0x2] ss:$0 sm:$0xff] }
 0x1d4   :  { %233 = vrot.lane.b32.xlu1 %v202_v40, %s503_s26 }
 0x1dc   :  { %248 = vrot.lane.b32.xlu1 %v202_v40, %s511_s20 }
 0x1e4   :  { %259 = vrot.lane.b32.xlu1 %v202_v40, %s512_s21 }
 0x1ec   :  { %271 = vrot.lane.b32.xlu1 %v202_v40, %s513_s22 }
 0x1f4   :  { %288 = vperm.xlu1 %426, %v645_v18  }
 0x1fc   :  { %429 = vset.pattern.permute.xlu1 %v499_v2 }
 0x1fd   :  { %309 = vperm.xlu1 %429, %v293_v13  }
 0x22e   :  { %v204_v41 = vpop.permute.xlu1 %203  ;;  %v283_v4 = vpop.permute.xlu0 %282 }
 0x22f   :  { %v205_v50 = vmul.f32 %v622_v21, %v204_v41  ;;  %v286_v19 = vmul.f32 %v435_v15, %v283_v4 }
 0x231   :  { %v212_v55 = vmul.f32 %v210_v34, %v205_v50 }
 0x236   :  { %v214_v43 = vpop.permute.xlu1 %213  ;;  %v303_v6 = vpop.permute.xlu0 %302 }
 0x237   :  { %v215_v48 = vmul.f32 %v617_v20, %v214_v43  ;;  %v438_v20 = vld [vmem:[%s705_s1 + $0x8] ss:$0 sm:$0xff] }
 0x239   :  { %v220_v2 = vmul.f32 %v218_v42, %v215_v48  ;;  %v322_v48 = vld [vmem:[%s712_s8] sm:$0xff]  ;;  %s367_s8 = sshll.u32 %s714_s10, 4  ;;  %s368_s8 = int_to_ptr.hbm [resolvable:$true] %s367_s8 }
 0x23b   :  { %v221_v58 = vadd.f32 %v220_v2, %v212_v55  ;;  %v323_v2 = vld [vmem:[%s713_s9] sm:$0xff] }
 0x23e   :  { %v223_v44 = vpop.permute.xlu1 %222 }
 0x23f   :  { %v226_v51 = vmul.f32 %v436_v0, %v223_v44 }
 0x241   :  { %v231_v56 = vmul.f32 %v229_v53, %v226_v51 }
 0x243   :  { %v232_v60 = vadd.f32 %v231_v56, %v221_v58 }
 0x246   :  { %v234_v46 = vpop.permute.xlu1 %233 }
 0x247   :  { %v235_v52 = vmul.f32 %v629_v25, %v234_v46  ;;  %v439_v25 = vld [vmem:[%s705_s1 + $0x9] ss:$0 sm:$0xff] }
 0x249   :  { %v240_v59 = vmul.f32 %v238_v35, %v235_v52 }
 0x24b   :  { %v241_v62 = vadd.f32 %v240_v59, %v232_v60 }
 0x24d   :  { %v247_v5 = vadd.f32 %v246_v7, %v241_v62 }
 0x24e   :  { %v249_v8 = vpop.permute.xlu1 %248 }
 0x24f   :  { %v252_v21 = vmul.f32 %v437_v57, %v249_v8 }
 0x251   :  { %v257_v12 = vmul.f32 %v255_v47, %v252_v21 }
 0x253   :  { %v258_v17 = vadd.f32 %v257_v12, %v247_v5 }
 0x256   :  { %v260_v54 = vpop.permute.xlu1 %259 }
 0x257   :  { %v264_v63 = vmul.f32 %v438_v20, %v260_v54 }
 0x259   :  { %v269_v16 = vmul.f32 %v267_v49, %v264_v63 }
 0x25b   :  { %v270_v22 = vadd.f32 %v269_v16, %v258_v17 }
 0x25e   :  { %v272_v3 = vpop.permute.xlu1 %271 }
 0x25f   :  { %v275_v14 = vmul.f32 %v439_v25, %v272_v3 }
 0x261   :  { %v280_v18 = vmul.f32 %v278_v61, %v275_v14 }
 0x263   :  { %v281_v24 = vadd.f32 %v280_v18, %v270_v22 }
 0x266   :  { %v289_v9 = vpop.permute.xlu1 %288 }
 0x267   :  { %v291_v26 = vmul.f32 %v289_v9, %v286_v19 }
 0x269   :  { %v292_v27 = vadd.f32 %v291_v26, %v281_v24 }
 0x26b   :  { %v299_v1 = vperm.slane %v292_v27, 0  ;;  %v305_v28 = vperm.slane %v292_v27, 1  ;;  %v319_v30 = vperm.slane %v292_v27, 3  ;;  %v312_v31 = vperm.slane %v292_v27, 2 }
 0x26d   :  { %v300_v10 = vmul.f32 %v299_v1, %v297_v23  ;;  %v306_v29 = vmul.f32 %v305_v28, %v303_v6  ;;  %v320_v35 = vmul.f32 %v319_v30, %v317_v32 }
 0x26f   :  { %v307_v11 = vadd.f32 %v306_v29, %v300_v10  ;;  %v310_v33 = vpop.permute.xlu1 %309 }
 0x270   :  { %v313_v34 = vmul.f32 %v312_v31, %v310_v33 }
 0x272   :  { %v314_v36 = vadd.f32 %v313_v34, %v307_v11 }
 0x274   :  { %v321_v37 = vadd.f32 %v320_v35, %v314_v36 }
 0x276   :  { %324 = vadd.xlane.f32.xlu1 %v321_v37  ;;  %v326_v38 = vmul.f32 %v321_v37, %v321_v37 }
 0x278   :  { %327 = vadd.xlane.f32.xlu2 %v326_v38 }
 0x2e9   :  { %v325_v39 = vpop.xlane.xlu1 %324 }
 0x2ea   :  { %v329_v40 = vmul.f32 0.0078125, %v325_v39 }
 0x2eb   :  { %v328_v13 = vpop.xlane.xlu2 %327 }
 0x2ec   :  { %v331_v41 = vmul.f32 %v329_v40, %v329_v40  ;;  %v330_v42 = vmul.f32 0.0078125, %v328_v13  ;;  %v344_v53 = vsub.f32 %v321_v37, %v329_v40 }
 0x2ee   :  { %v332_v43 = vsub.f32 %v330_v42, %v331_v41 }
 0x2f0   :  { %v333_v44 = vadd.f32 1e-05, %v332_v43 }
 0x2f2   :  { %442 = vrsqrt.f32 %v333_v44  ;;  %vm340_vm5 = vweird.f32 %v333_v44 }
 0x2f8   :  { %v443_v45 = vpop.eup %442 }
 0x2f9   :  { %v335_v46 = vmul.f32 %v443_v45, %v333_v44  ;;  %vm341_vm4 = vweird.f32 %v443_v45 }
 0x2fa   :  { %vm342_vm6 = vmor %vm340_vm5, %vm341_vm4 }
 0x2fb   :  { %v336_v47 = vmul.f32 %v443_v45, %v335_v46 }
 0x2fd   :  { %v337_v8 = vmul.f32 0.5, %v336_v47 }
 0x2ff   :  { %v338_v0 = vsub.f32 1.5, %v337_v8 }
 0x301   :  { %v339_v49 = vmul.f32 %v443_v45, %v338_v0 }
 0x303   :  { %v343_v50 = vsel %vm342_vm6, %v443_v45, %v339_v49 }
 0x304   :  { %v345_v51 = vmul.f32 %v343_v50, %v322_v48 }
 0x306   :  { %348 = vperm.xlu0 %431, %v345_v51  }
 0x30e   :  { %354 = vperm.xlu0 %431, %v323_v2  }
 0x378   :  { %v349_v52 = vpop.permute.xlu0 %348 }
 0x379   :  { %v351_v54 = vmul.f32 %v349_v52, %v344_v53 }
 0x380   :  { %v355_v55 = vpop.permute.xlu0 %354 }
 0x381   :  { %v357_v56 = vadd.f32 %v355_v55, %v351_v54 }
 0x383   :  { %v358_v57 = vmax.f32 %v357_v56, 0.0 }
 0x385   :  { %359 = vst [vmem:[#allocation5] sm:$0xff] %v358_v57 }
 0x386   :  { %370 = dma.vmem_to_hbm [thread:$0]  %s366_s15, 128, %s368_s8, [#allocation4]  }
 0x387   :  { %494 = dma.done.wait [#allocation4], 128  }
 0x388   :  { %495 = vsyncadd [#allocation4], 4294967168 }
 0x389   :  { %375 = vsyncpa [#allocation3], 1 }
 0x38a   :  { %376 = vsyncpa [#allocation4], 1 }

</bundles_post_ra>
